<compile_context>
chip_gen: v6e
topology: v6e:2x2x1
jax: 0.10.0
libtpu: 0.0.40
codegen_flags: <defaults>
</compile_context>

<pallas_src>
import jax
import jax.numpy as jnp
from jax import lax
from jax.experimental import pallas as pl
from jax.experimental.pallas import tpu as pltpu


def _round_up(a: int, b: int) -> int:
    return ((a + b - 1) // b) * b


# ---------------------------------------------------------------------------
# Kernel 1: per-node projection   r = [ leaky_relu(x@W1^T+b1) @ W2a + b2 | ... @ W2b ]
# ---------------------------------------------------------------------------
def node_kernel(x_ref, w1t_ref, b1_ref, w2cat_ref, b2pad_ref, r_ref):
    x = x_ref[...]                                                   # [TN, F_in] f32
    if x_ref.shape[1] == 1:
        # F_in == 1: VPU broadcast multiply-add instead of a K=1 MXU matmul.
        h = x * w1t_ref[...] + b1_ref[...]                           # [TN,1]*[1,5] -> [TN,5]
    else:
        h = jnp.dot(x, w1t_ref[...],
                    preferred_element_type=jnp.float32) + b1_ref[...]
    h = jnp.where(h > 0, h, 0.01 * h)                                # leaky_relu (slope 0.01)
    # Fused per-node projection: cols 0:2 -> p (+b2, applied to y=h[dst]),
    #                            cols 2:4 -> q       (applied to z=h[src]).
    r_ref[...] = (jnp.dot(h, w2cat_ref[...],
                          preferred_element_type=jnp.float32) + b2pad_ref[...])


# ---------------------------------------------------------------------------
# Kernel 2: per-edge gather + add.  out[e] = r[dst[e], 0:2] + r[src[e], 2:4]
#           (b2 already folded into the p columns of r)
# ---------------------------------------------------------------------------
def edge_kernel(src_ref, dst_ref, r_ref, out_ref):
    te = out_ref.shape[0]
    base = pl.program_id(0) * te

    def body(i, carry):
        s = src_ref[base + i]                       # SMEM scalar reads
        d = dst_ref[base + i]
        row_d = r_ref[pl.ds(d, 1), :]               # [1, 4] dynamic sublane row read
        row_s = r_ref[pl.ds(s, 1), :]               # [1, 4]
        out_ref[pl.ds(i, 1), :] = row_d[:, 0:2] + row_s[:, 2:4]
        return carry

    lax.fori_loop(0, te, body, 0, unroll=8)


# ---------------------------------------------------------------------------
# Wrapper
# ---------------------------------------------------------------------------
def net_lin_forward(x, edge_index, w1, b1, w2, b2, *, tn=256, te=512):
    """x: [N, F_in] f32; edge_index: [2, E] int; weights in PyTorch nn.Linear layout."""
    N, F_in = x.shape
    E = edge_index.shape[1]

    # --- tile sizes (multiples of 8), pad N / E so the grid divides evenly ---
    tn = _round_up(max(8, min(tn, _round_up(N, 8))), 8)
    te = _round_up(max(8, min(te, _round_up(E, 8))), 8)
    n_pad = _round_up(N, tn)
    e_pad = _round_up(E, te)

    x_p = jnp.pad(x.astype(jnp.float32), ((0, n_pad - N), (0, 0)))
    src = jnp.pad(edge_index[0].astype(jnp.int32), (0, e_pad - E))   # padded edges hit node 0
    dst = jnp.pad(edge_index[1].astype(jnp.int32), (0, e_pad - E))

    # --- parameter repacking (PyTorch nn.Linear layout -> kernel layout) ---
    w1t = w1.T.astype(jnp.float32)                                   # [F_in, 5]
    b1r = b1.reshape(1, 5).astype(jnp.float32)
    w2t = w2.T.astype(jnp.float32)                                   # [10, 2]
    w2cat = jnp.concatenate([w2t[:5, :], w2t[5:, :]], axis=1)        # [5, 4] = [W2a | W2b]
    b2pad = jnp.concatenate([b2.reshape(1, 2).astype(jnp.float32),
                             jnp.zeros((1, 2), jnp.float32)], axis=1)  # [1, 4]

    # --- stage 1: per-node projections r [n_pad, 4], tiled & parallel over nodes ---
    r = pl.pallas_call(
        node_kernel,
        out_shape=jax.ShapeDtypeStruct((n_pad, 4), jnp.float32),
        grid=(n_pad // tn,),
        in_specs=[
            pl.BlockSpec((tn, F_in), lambda i: (i, 0)),
            pl.BlockSpec((F_in, 5), lambda i: (0, 0)),
            pl.BlockSpec((1, 5), lambda i: (0, 0)),
            pl.BlockSpec((5, 4), lambda i: (0, 0)),
            pl.BlockSpec((1, 4), lambda i: (0, 0)),
        ],
        out_specs=pl.BlockSpec((tn, 4), lambda i: (i, 0)),
        compiler_params=pltpu.CompilerParams(dimension_semantics=("parallel",)),
    )(x_p, w1t, b1r, w2cat, b2pad)

    # --- stage 2: edge gather + add, tiled & parallel over edges ---
    out_p = pl.pallas_call(
        edge_kernel,
        out_shape=jax.ShapeDtypeStruct((e_pad, 2), jnp.float32),
        grid_spec=pltpu.PrefetchScalarGridSpec(
            num_scalar_prefetch=2,                                   # src, dst -> SMEM
            grid=(e_pad // te,),
            in_specs=[pl.BlockSpec((n_pad, 4), lambda i, s, d: (0, 0))],  # r resident in VMEM
            out_specs=pl.BlockSpec((te, 2), lambda i, s, d: (i, 0)),
        ),
        compiler_params=pltpu.CompilerParams(dimension_semantics=("parallel",)),
    )(src, dst, r)

    out = out_p[:E]
    return out, out   # module returns (x, x2) where both are the Linear2 output


if __name__ == "__main__":
    key = jax.random.PRNGKey(0)
    kx, ke, kw1, kb1, kw2, kb2 = jax.random.split(key, 6)

    N, E, input_size = 48, 200, 1
    x = jax.random.normal(kx, (N, input_size), dtype=jnp.float32)
    edge_index = jax.random.randint(ke, (2, E), 0, N, dtype=jnp.int32)

    # Deterministic parameter init mimicking nn.Linear (uniform(-1/sqrt(fan_in), +1/sqrt(fan_in)))
    lim1 = 1.0 / (input_size ** 0.5)
    w1 = jax.random.uniform(kw1, (5, input_size), minval=-lim1, maxval=lim1, dtype=jnp.float32)
    b1 = jax.random.uniform(kb1, (5,), minval=-lim1, maxval=lim1, dtype=jnp.float32)
    lim2 = 1.0 / (10.0 ** 0.5)
    w2 = jax.random.uniform(kw2, (2, 10), minval=-lim2, maxval=lim2, dtype=jnp.float32)
    b2 = jax.random.uniform(kb2, (2,), minval=-lim2, maxval=lim2, dtype=jnp.float32)

    # Small tiles so the demo actually exercises multi-tile grids (2 node tiles, 4 edge tiles).
    out, out2 = net_lin_forward(x, edge_index, w1, b1, w2, b2, tn=32, te=64)
    jax.block_until_ready(out)

    # Pure-JAX reference (inference path: dropout p=0 identity)
    h_ref = x @ w1.T + b1
    h_ref = jnp.where(h_ref > 0, h_ref, 0.01 * h_ref)
    z_ref = h_ref[edge_index[0, :], :]
    y_ref = h_ref[edge_index[1, :], :]
    ref = jnp.concatenate([y_ref, z_ref], axis=1) @ w2.T + b2

    assert out.shape == (E, 2)
    assert jnp.allclose(out, ref, atol=1e-5, rtol=1e-5), "mismatch vs reference"
    assert jnp.allclose(out2, ref, atol=1e-5, rtol=1e-5), "mismatch vs reference (second output)"
    print("KERNEL_OK")
</pallas_src>

<mosaic_0001>
module attributes {stable_mosaic.version = 11 : i64} {
  func.func @node_kernel(%arg0: i32, %arg1: memref<32x1xf32, #tpu.memory_space<vmem>>, %arg2: memref<1x5xf32, #tpu.memory_space<vmem>>, %arg3: memref<1x5xf32, #tpu.memory_space<vmem>>, %arg4: memref<5x4xf32, #tpu.memory_space<vmem>>, %arg5: memref<1x4xf32, #tpu.memory_space<vmem>>, %arg6: memref<32x4xf32, #tpu.memory_space<vmem>>) attributes {dimension_semantics = [#tpu.dimension_semantics<parallel>], iteration_bounds = array<i64: 2>, scalar_prefetch = 0 : i64, scratch_operands = 0 : i64, tpu.core_type = #tpu.core_type<tc>, window_params = [{transform_indices = @transform_0, window_bounds = array<i64: 32, 1>}, {pipeline_mode = #tpu.pipeline_mode<synchronous>, transform_indices = @transform_1, window_bounds = array<i64: 1, 5>}, {pipeline_mode = #tpu.pipeline_mode<synchronous>, transform_indices = @transform_2, window_bounds = array<i64: 1, 5>}, {pipeline_mode = #tpu.pipeline_mode<synchronous>, transform_indices = @transform_3, window_bounds = array<i64: 5, 4>}, {pipeline_mode = #tpu.pipeline_mode<synchronous>, transform_indices = @transform_4, window_bounds = array<i64: 1, 4>}, {transform_indices = @transform_5, window_bounds = array<i64: 32, 4>}]} {
    %c0 = arith.constant 0 : index
    %c0_0 = arith.constant 0 : index
    %0 = vector.load %arg1[%c0, %c0_0] : memref<32x1xf32, #tpu.memory_space<vmem>>, vector<32x1xf32>
    %c0_1 = arith.constant 0 : index
    %c0_2 = arith.constant 0 : index
    %1 = vector.load %arg2[%c0_1, %c0_2] : memref<1x5xf32, #tpu.memory_space<vmem>>, vector<1x5xf32>
    %2 = vector.broadcast %0 : vector<32x1xf32> to vector<32x5xf32>
    %3 = vector.broadcast %1 : vector<1x5xf32> to vector<32x5xf32>
    %4 = arith.mulf %2, %3 : vector<32x5xf32>
    %c0_3 = arith.constant 0 : index
    %c0_4 = arith.constant 0 : index
    %5 = vector.load %arg3[%c0_3, %c0_4] : memref<1x5xf32, #tpu.memory_space<vmem>>, vector<1x5xf32>
    %6 = vector.broadcast %5 : vector<1x5xf32> to vector<32x5xf32>
    %7 = arith.addf %4, %6 : vector<32x5xf32>
    %cst = arith.constant 0.000000e+00 : f32
    %8 = vector.broadcast %cst : f32 to vector<32x5xf32>
    %9 = arith.cmpf ogt, %7, %8 : vector<32x5xf32>
    %cst_5 = arith.constant 0.00999999977 : f32
    %10 = vector.broadcast %cst_5 : f32 to vector<32x5xf32>
    %11 = arith.mulf %10, %7 : vector<32x5xf32>
    %12 = arith.select %9, %7, %11 : vector<32x5xi1>, vector<32x5xf32>
    %c0_6 = arith.constant 0 : index
    %c0_7 = arith.constant 0 : index
    %13 = vector.load %arg4[%c0_6, %c0_7] : memref<5x4xf32, #tpu.memory_space<vmem>>, vector<5x4xf32>
    %cst_8 = arith.constant dense<0.000000e+00> : vector<32x4xf32>
    %14 = tpu.matmul %12, %13, %cst_8 {dimension_numbers = #tpu.dot_dimension_numbers<[1], [0], [0], [1], [0, 0, 1, 1], [], []>} : vector<32x5xf32>, vector<5x4xf32>, vector<32x4xf32> -> vector<32x4xf32>
    %c0_9 = arith.constant 0 : index
    %c0_10 = arith.constant 0 : index
    %15 = vector.load %arg5[%c0_9, %c0_10] : memref<1x4xf32, #tpu.memory_space<vmem>>, vector<1x4xf32>
    %16 = vector.broadcast %15 : vector<1x4xf32> to vector<32x4xf32>
    %17 = arith.addf %14, %16 : vector<32x4xf32>
    %c0_11 = arith.constant 0 : index
    %c0_12 = arith.constant 0 : index
    %18 = vector.load %arg6[%c0_11, %c0_12] : memref<32x4xf32, #tpu.memory_space<vmem>>, vector<32x4xf32>
    tpu.vector_store %arg6[%c0_11, %c0_12], %17 {strides = array<i32>} : memref<32x4xf32, #tpu.memory_space<vmem>>, vector<32x4xf32>,
    return
  }
  func.func @transform_0(%arg0: i32) -> (i32, i32) {
    %c0_i32 = arith.constant 0 : i32
    %c0_i32_0 = arith.constant 0 : i32
    return %arg0, %c0_i32 : i32, i32
  }
  func.func @transform_1(%arg0: i32) -> (i32, i32) {
    %c0_i32 = arith.constant 0 : i32
    %c0_i32_0 = arith.constant 0 : i32
    %c0_i32_1 = arith.constant 0 : i32
    return %c0_i32, %c0_i32_0 : i32, i32
  }
  func.func @transform_2(%arg0: i32) -> (i32, i32) {
    %c0_i32 = arith.constant 0 : i32
    %c0_i32_0 = arith.constant 0 : i32
    %c0_i32_1 = arith.constant 0 : i32
    return %c0_i32, %c0_i32_0 : i32, i32
  }
  func.func @transform_3(%arg0: i32) -> (i32, i32) {
    %c0_i32 = arith.constant 0 : i32
    %c0_i32_0 = arith.constant 0 : i32
    %c0_i32_1 = arith.constant 0 : i32
    return %c0_i32, %c0_i32_0 : i32, i32
  }
  func.func @transform_4(%arg0: i32) -> (i32, i32) {
    %c0_i32 = arith.constant 0 : i32
    %c0_i32_0 = arith.constant 0 : i32
    %c0_i32_1 = arith.constant 0 : i32
    return %c0_i32, %c0_i32_0 : i32, i32
  }
  func.func @transform_5(%arg0: i32) -> (i32, i32) {
    %c0_i32 = arith.constant 0 : i32
    %c0_i32_0 = arith.constant 0 : i32
    return %arg0, %c0_i32 : i32, i32
  }
}

</mosaic_0001>

<bundles_post_ra>
// kernel: tpu_custom_call.1
= control target key start
LH: loop header
LB: loop body
LE: loop exit
PB: predicated region body
PF: predicated region fallthrough
CT: control target
= control target key end

     0   :  { %s541_s18 = smov 0   ;;  %s581_s0 = inlined_call_operand.vmem [shape: f32[64,1], index: 0, kind: input, shape index: {}]   ;;  %s582_s1 = inlined_call_operand.vmem [shape: f32[1,5], index: 1, kind: input, shape index: {}]   ;;  %s583_s2 = inlined_call_operand.vmem [shape: f32[1,5], index: 2, kind: input, shape index: {}]   ;;  %s584_s3 = inlined_call_operand.vmem [shape: f32[5,4], index: 3, kind: input, shape index: {}]   ;;  %s585_s4 = inlined_call_operand.vmem [shape: f32[1,4], index: 4, kind: input, shape index: {}]   ;;  %s586_s5 = inlined_call_operand.vmem [shape: f32[64,4], index: 5, kind: output, shape index: {}]  }
   0x1 LB: > { %s457_s19 = sadd.s32 4294967295, %s508_s18   ;;  %p461_p0 = scmp.ge.s32.totalorder %s508_s18, 1  ;;  %s508_s18 = sphi %s541_s18, %s15_s18  }
   0x2   : > { %p188_p1 = scmp.lt.s32.totalorder %s508_s18, 3 }
   0x4   : > { %p189_p2 = pnand %p461_p0, %p188_p1 }
   0x5   : > { %s462_s20 = sshll.u32 (!%p189_p2), %s457_s19, 2 }
   0x6   : > { %192 = sbr.rel (%p189_p2) target bundleno = 348 (0x15c), region = 40  ;;  %p217_p3 = scmp.lt.s32.totalorder (!%p189_p2), %s462_s20, 7 }
   0xb   : > { %v510_v0 = vmov 0   ;;  %s588_s20 = smov (!%p217_p3, %s462_s20), 7  ;;  %v286_v5 = vld [vmem:[%s584_s3] sm:$0x1f]  ;;  %vm307_vm0 = vcmask 1044480   ;;  %vm294_vm1 = vcmask 39936  }
   0xc   : > { %501 = vset.pattern.permute.xlu1 %v510_v0  ;;  %500 = vset.pattern.permute.xlu0 %v510_v0  ;;  %s463_s21 = sshll.u32 %s588_s20, 3  ;;  %v466_v6 = vld [vmem:[%s582_s1] ss:$0 sm:$0xff]  ;;  %vm396_vm6 = vcmask 31744  }
   0xd   : > { %s220_s24 = scalar_lea.vmem %s581_s0, %s463_s21  ;;  %481 = vmatprep.subr.msk.mxu0 %vm307_vm0, %v286_v5  ;;  %489 = vmatprep.subr.msk.mxu1 %vm307_vm0, %v286_v5  ;;  %v467_v7 = vld [vmem:[%s583_s2] ss:$0 sm:$0xff]  ;;  %s226_s10 = scalar_lea.vmem %s586_s5, %s463_s21 }
   0xe   : > { %v230_v1 = vld [vmem:[%s220_s24 + $0x10] sm:$0xff]  ;;  %v228_v2 = vld [vmem:[%s220_s24] sm:$0xff]  ;;  %v231_v3 = vld [vmem:[%s220_s24 + $0x18] sm:$0xff]  ;;  %482 = vmatpush3.msk.msra.mxu0 %vm307_vm0, %v286_v5  ;;  %490 = vmatpush3.msk.msra.mxu1 %vm307_vm0, %v286_v5 }
   0xf   : > { %245 = vperm.xlu1 %501, %v230_v1   ;;  %235 = vperm.xlu0 %500, %v228_v2   ;;  %v229_v4 = vld [vmem:[%s220_s24 + $0x8] sm:$0xff]  ;;  %v468_v30 = vld [vmem:[%s585_s4] ss:$0 sm:$0xff] }
  0x13   : > { %250 = vperm.xlu1 %501, %v231_v3   ;;  %240 = vperm.xlu0 %500, %v229_v4  }
  0x8a   : > { %v246_v8 = vpop.permute.xlu1 %245  ;;  %v236_v9 = vpop.permute.xlu0 %235 }
  0x8b   : > { %v261_v10 = vmul.f32 %v466_v6, %v246_v8  ;;  %v259_v11 = vmul.f32 %v466_v6, %v236_v9 }
  0x8d   : > { %v272_v12 = vadd.f32 %v467_v7, %v261_v10  ;;  %v270_v13 = vadd.f32 %v467_v7, %v259_v11 }
  0x8e   : > { %v251_v14 = vpop.permute.xlu1 %250  ;;  %v241_v15 = vpop.permute.xlu0 %240 }
  0x8f   : > { %v262_v16 = vmul.f32 %v466_v6, %v251_v14  ;;  %v260_v17 = vmul.f32 %v466_v6, %v241_v15  ;;  %vm274_vm2 = vcmp.gt.f32.partialorder %v270_v13, 0.0  ;;  %v278_v18 = vmul.f32 0.01, %v270_v13 }
  0x90   : > { %vm276_vm3 = vcmp.gt.f32.partialorder %v272_v12, 0.0  ;;  %v280_v19 = vmul.f32 0.01, %v272_v12 }
  0x91   : > { %v273_v20 = vadd.f32 %v467_v7, %v262_v16  ;;  %v271_v21 = vadd.f32 %v467_v7, %v260_v17  ;;  %v282_v22 = vsel %vm274_vm2, %v270_v13, %v278_v18 }
  0x92   : > { %483 = vmatprep.mubr.msk.f32.mxu0 %vm294_vm1, %v282_v22  ;;  %v284_v23 = vsel %vm276_vm3, %v272_v12, %v280_v19 }
  0x93   : > { %v281_v24 = vmul.f32 0.01, %v273_v20  ;;  %v279_v25 = vmul.f32 0.01, %v271_v21  ;;  %486 = vmatprep.mubr.msk.f32.mxu1 %vm294_vm1, %v284_v23  ;;  %vm275_vm4 = vcmp.gt.f32.partialorder %v271_v21, 0.0  ;;  %vm277_vm5 = vcmp.gt.f32.partialorder %v273_v20, 0.0 }
  0x95   : > { %v283_v26 = vsel %vm275_vm4, %v271_v21, %v279_v25  ;;  %v285_v27 = vsel %vm277_vm5, %v273_v20, %v281_v24 }
  0x96   : > { %484 = vmatmul.mubr.msk.f32.vlgmr.msra.gmra.mxu0 %vm294_vm1, %v283_v26  ;;  %487 = vmatmul.mubr.msk.f32.vlgmr.msra.gmra.mxu1 %vm294_vm1, %v285_v27 }
 0x156   : > { %v485_v28 = vpop.f32.mrf.mxu0  ;;  %v488_v29 = vpop.f32.mrf.mxu1 }
 0x157   : > { %v383_v34 = vadd.f32 %v485_v28, %v468_v30  ;;  %v393_v36 = vadd.f32 %v488_v29, %v468_v30 }
 0x158   : > { %v377_v31 = vpop.f32.mrf.mxu0  ;;  %v387_v32 = vpop.f32.mrf.mxu1 }
 0x159   : > { %v378_v33 = vadd.f32 %v468_v30, %v377_v31  ;;  %v388_v35 = vadd.f32 %v468_v30, %v387_v32  ;;  %398 = vst.msk [vmem:[%s226_s10 + $0x8] sm:$0xff] %vm396_vm6, %v383_v34  ;;  %400 = vst.msk [vmem:[%s226_s10 + $0x18] sm:$0xff] %vm396_vm6, %v393_v36 }
 0x15b   : > { %397 = vst.msk [vmem:[%s226_s10] sm:$0xff] %vm396_vm6, %v378_v33  ;;  %399 = vst.msk [vmem:[%s226_s10 + $0x10] sm:$0xff] %vm396_vm6, %v388_v35 }
 0x15c PF: > { %s15_s18 = sadd.s32 1, %s508_s18  }
 0x15d   : > { %p12_p4 = scmp.ge.s32.totalorder %s15_s18, 4  }
 0x15f   :  { %14 = sbr.rel (!%p12_p4) target bundleno = 1 (0x1), region = 70 }

</bundles_post_ra>
